<compile_context>
chip_gen: v7x
topology: tpu7x:2x2x1
jax: 0.10.0
libtpu: 0.0.40
codegen_flags: <defaults>
</compile_context>

<pallas_src>
import jax
import jax.numpy as jnp
from jax.experimental import pallas as pl
from jax.experimental.pallas import tpu as pltpu

NEG_SLOPE = 0.2      # LeakyReLU(0.2)
BN_EPS = 1e-5        # PyTorch BatchNorm1d default eps
BLOCK_NUM = 3
_MIB = 1024 * 1024


def encoder3d_kernel(x_ref, w1_ref, sh1_ref, w2_ref, sh2_ref, wf_ref, bf_ref, o_ref):
    """One (1, C, tL) tile of the full FCBlock forward, NCL layout.

    x_ref   : (1, C, tL)   input tile (lanes = L)
    w1/w2   : (3, C, C)    bf16 conv weights with BN scale folded in (rows = C_out)
    sh1/sh2 : (3, C, 1)    f32 folded bias + BN shift (broadcasts over lanes)
    wf      : (C_out, C)   bf16 final conv weight
    bf      : (C_out, 1)   f32 final conv bias
    o_ref   : (1, C_out, tL)
    """
    x = x_ref[0].astype(jnp.float32)                      # residual path stays f32

    for i in range(BLOCK_NUM):                            # static unroll: 3 residual blocks
        y = jnp.dot(w1_ref[i], x.astype(jnp.bfloat16),
                    preferred_element_type=jnp.float32) + sh1_ref[i]
        y = jnp.maximum(y, NEG_SLOPE * y)                 # LeakyReLU; dropout = identity (eval)
        y = jnp.dot(w2_ref[i], y.astype(jnp.bfloat16),
                    preferred_element_type=jnp.float32) + sh2_ref[i]
        y = jnp.maximum(y, NEG_SLOPE * y)
        x = x + y                                         # residual

    out = jnp.dot(wf_ref[...], x.astype(jnp.bfloat16),
                  preferred_element_type=jnp.float32) + bf_ref[...]
    o_ref[0] = out.astype(o_ref.dtype)


# ----------------------------- sizing helpers ---------------------------------------

def _vmem_capacity_bytes():
    """Per-core VMEM capacity; conservative fallback if the query is unavailable."""
    try:
        return int(pltpu.get_tpu_info().vmem_capacity_bytes)
    except Exception:
        return 64 * _MIB            # v7x per-TensorCore VMEM (smallest generation)


def _resident_bytes(C, C_out):
    """Resident weights/shifts, counted double-buffered (conservative for fallback path)."""
    wt = (2 * BLOCK_NUM * C * C + C_out * C) * 2                  # bf16 weights
    sh = (2 * BLOCK_NUM * C + C_out) * 128 * 4                    # f32 shifts, lane-padded
    return 2 * (wt + sh)


def _tile_bytes(C, C_out, tl, in_sz, out_sz):
    pipeline = 2 * (C * tl * in_sz + C_out * tl * out_sz)         # double-buffered I/O tiles
    body = 6 * max(C, C_out) * tl * 4                             # f32/bf16 body intermediates
    return pipeline + body


def _choose_lane_tile(L, B, C, C_out, in_sz, out_sz, budget):
    """Largest 128-multiple lane tile (<=2048) that fits VMEM, keeping >=2 grid steps
    where possible (v7x megacore) and not padding beyond the 128-lane floor by >25%."""
    L128 = ((L + 127) // 128) * 128
    resident = _resident_bytes(C, C_out)

    def fits(t):
        return resident + _tile_bytes(C, C_out, t, in_sz, out_sz) <= budget

    for need_two_steps in (True, False):
        for allow_extra_pad in (False, True):
            for t in range(min(2048, L128), 0, -128):
                Lp = ((L128 + t - 1) // t) * t
                if not allow_extra_pad and Lp != L128:
                    continue
                if allow_extra_pad and (Lp - L128) * 4 > L128:    # >25% wasted work
                    continue
                if need_two_steps and B * (Lp // t) < 2:
                    continue
                if fits(t):
                    return t
    return 128


# ----------------------------- pallas_call builder -----------------------------------

def _build_call(out_dtype, B, C, C_out, Lp, tl, vmem_limit, *, single_buffer_weights):
    def const_spec(shape):
        index_map = lambda b, l: (0,) * len(shape)
        if single_buffer_weights:
            # Weights/shifts never change across the grid -> no double buffer.
            return pl.BlockSpec(shape, index_map, pipeline_mode=pl.Buffered(buffer_count=1))
        return pl.BlockSpec(shape, index_map)

    return pl.pallas_call(
        encoder3d_kernel,
        out_shape=jax.ShapeDtypeStruct((B, C_out, Lp), out_dtype),
        grid=(B, Lp // tl),
        in_specs=[
            pl.BlockSpec((1, C, tl), lambda b, l: (b, 0, l)),   # x tile (lane-dense in L)
            const_spec((BLOCK_NUM, C, C)),                      # w1 (bf16, BN-folded)
            const_spec((BLOCK_NUM, C, 1)),                      # shift1 (f32)
            const_spec((BLOCK_NUM, C, C)),                      # w2 (bf16, BN-folded)
            const_spec((BLOCK_NUM, C, 1)),                      # shift2 (f32)
            const_spec((C_out, C)),                             # wf (bf16)
            const_spec((C_out, 1)),                             # bf (f32)
        ],
        out_specs=pl.BlockSpec((1, C_out, tl), lambda b, l: (b, 0, l)),
        compiler_params=pltpu.CompilerParams(
            dimension_semantics=("parallel", "parallel"),
            vmem_limit_bytes=vmem_limit,
        ),
    )


def encoder3d_forward(x_ncl, kparams, *, tl=None, out_dtype=None):
    """x_ncl: (B, C, L) NCL as in PyTorch Conv1d. Returns (B, C_out, L).

    tl=None auto-selects the lane tile; out_dtype=None keeps the input dtype
    (pass jnp.bfloat16 to halve output HBM traffic when downstream allows it).
    """
    B, C, L = x_ncl.shape
    C_out = kparams["wf"].shape[0]
    out_dtype = x_ncl.dtype if out_dtype is None else out_dtype

    # Generation-aware VMEM budget: half the reported per-core capacity, clamped to a
    # range that is safe on v7x (64 MiB physical) and still lets v5e/v6e (128 MiB) use
    # big tiles.  vmem_limit raises Mosaic's scoped limit for this kernel only.
    capacity = _vmem_capacity_bytes()
    vmem_limit = min(max(capacity // 2, 28 * _MIB), 100 * _MIB, max(capacity - 8 * _MIB, 28 * _MIB))
    tile_budget = vmem_limit - 2 * _MIB

    in_sz = jnp.dtype(x_ncl.dtype).itemsize
    out_sz = jnp.dtype(out_dtype).itemsize
    if tl is None:
        tl = _choose_lane_tile(L, B, C, C_out, in_sz, out_sz, tile_budget)
    assert tl % 128 == 0, "lane tile must be a multiple of 128"

    # TODO(synk): for very large C (resident bf16 weights approaching the v7x VMEM cap,
    # roughly C >~ 1100) stream the per-block weights over an 'arbitrary' grid axis
    # instead of keeping all of them resident.

    # k=1 conv / BN / LeakyReLU are pointwise along L -> zero-pad L to a full tile and
    # slice it off afterward.  Padded (zero) lanes compute finite shift->LeakyReLU
    # values (folded shifts are finite), so no NaN/Inf can leak into valid lanes.
    Lp = ((L + tl - 1) // tl) * tl
    x_p = jnp.pad(x_ncl, ((0, 0), (0, 0), (0, Lp - L))) if Lp != L else x_ncl

    args = (x_p, kparams["w1"], kparams["sh1"], kparams["w2"], kparams["sh2"],
            kparams["wf"], kparams["bf"])

    try:
        out = _build_call(out_dtype, B, C, C_out, Lp, tl, vmem_limit,
                          single_buffer_weights=True)(*args)
    except Exception as e:
        # Narrow fallback: only retry with default double-buffered weight specs when the
        # failure is actually about the Buffered(1) pipeline mode; re-raise anything else.
        msg = str(e)
        if not any(k in msg for k in ("Buffered", "buffer_count", "pipeline_mode")):
            raise
        out = _build_call(out_dtype, B, C, C_out, Lp, tl, vmem_limit,
                          single_buffer_weights=False)(*args)

    return out[:, :, :L] if Lp != L else out


# ----------------------------- params & reference ------------------------------------

def init_raw_params(key, channel, channel_out=None):
    """Deterministic synthetic params with the PyTorch module's shapes (eval mode)."""
    C = channel
    C_out = C if channel_out is None else channel_out
    ks = jax.random.split(key, 14)
    n = jax.random.normal
    return dict(
        w1=0.1 * n(ks[0], (BLOCK_NUM, C, C), jnp.float32),   # Conv1d weight (C_out, C_in)
        b1=0.1 * n(ks[1], (BLOCK_NUM, C), jnp.float32),
        w2=0.1 * n(ks[2], (BLOCK_NUM, C, C), jnp.float32),
        b2=0.1 * n(ks[3], (BLOCK_NUM, C), jnp.float32),
        g1=1.0 + 0.1 * n(ks[4], (BLOCK_NUM, C), jnp.float32),
        be1=0.1 * n(ks[5], (BLOCK_NUM, C), jnp.float32),
        m1=0.1 * n(ks[6], (BLOCK_NUM, C), jnp.float32),
        v1=0.5 + jax.random.uniform(ks[7], (BLOCK_NUM, C), jnp.float32),
        g2=1.0 + 0.1 * n(ks[8], (BLOCK_NUM, C), jnp.float32),
        be2=0.1 * n(ks[9], (BLOCK_NUM, C), jnp.float32),
        m2=0.1 * n(ks[10], (BLOCK_NUM, C), jnp.float32),
        v2=0.5 + jax.random.uniform(ks[11], (BLOCK_NUM, C), jnp.float32),
        wf=0.1 * n(ks[12], (C_out, C), jnp.float32),
        bf=0.1 * n(ks[13], (C_out,), jnp.float32),
    )


def prepare_kernel_params(raw):
    """Fold conv bias + BatchNorm (eval) into the weights; cast weights to bf16."""
    def fold(w, b, gamma, beta, mean, var):
        s = gamma * jax.lax.rsqrt(var + BN_EPS)              # (BLOCK_NUM, C)
        w_f = (w * s[:, :, None]).astype(jnp.bfloat16)       # scale C_out rows
        shift = (b * s + beta - mean * s)[:, :, None]        # (BLOCK_NUM, C, 1) f32
        return w_f, shift

    w1, sh1 = fold(raw["w1"], raw["b1"], raw["g1"], raw["be1"], raw["m1"], raw["v1"])
    w2, sh2 = fold(raw["w2"], raw["b2"], raw["g2"], raw["be2"], raw["m2"], raw["v2"])
    return dict(w1=w1, sh1=sh1, w2=w2, sh2=sh2,
                wf=raw["wf"].astype(jnp.bfloat16),
                bf=raw["bf"][:, None].astype(jnp.float32))


def reference_forward(x_ncl, raw):
    """Pure-JAX float32 reference of the PyTorch forward pass (eval mode)."""
    h = x_ncl.astype(jnp.float32)                            # (B, C, L)

    def bn(y, gamma, beta, mean, var):
        inv = jax.lax.rsqrt(var + BN_EPS)
        return (y - mean[None, :, None]) * (gamma * inv)[None, :, None] + beta[None, :, None]

    for i in range(BLOCK_NUM):
        y = jnp.einsum("oc,bcl->bol", raw["w1"][i], h) + raw["b1"][i][None, :, None]
        y = bn(y, raw["g1"][i], raw["be1"][i], raw["m1"][i], raw["v1"][i])
        y = jnp.where(y >= 0, y, NEG_SLOPE * y)
        y = jnp.einsum("oc,bcl->bol", raw["w2"][i], y) + raw["b2"][i][None, :, None]
        y = bn(y, raw["g2"][i], raw["be2"][i], raw["m2"][i], raw["v2"][i])
        y = jnp.where(y >= 0, y, NEG_SLOPE * y)
        h = h + y
    return jnp.einsum("oc,bcl->bol", raw["wf"], h) + raw["bf"][None, :, None]


if __name__ == "__main__":
    B, C, L = 2, 32, 256                 # (batch, channels = args.channel, sequence length)
    key = jax.random.PRNGKey(0)
    kx, kp = jax.random.split(key)

    x = jax.random.normal(kx, (B, C, L), jnp.float32)        # PyTorch NCL layout
    raw = init_raw_params(kp, C)
    kparams = prepare_kernel_params(raw)

    out = jax.block_until_ready(encoder3d_forward(x, kparams))      # auto tile selection
    ref = jax.block_until_ready(reference_forward(x, raw))

    assert out.shape == (B, C, L)
    # Tolerance loosened vs. the pure-f32 reference because MXU operands are bf16
    # (accumulation and all elementwise math remain f32); at C=32 this is comfortable.
    assert jnp.allclose(out, ref, atol=5e-2, rtol=5e-2), (
        f"mismatch vs reference; max abs diff = {jnp.max(jnp.abs(out - ref))}")

    print("KERNEL_OK")
</pallas_src>

<mosaic_0001>
module attributes {stable_mosaic.version = 11 : i64} {
  func.func @encoder3d_kernel(%arg0: i32, %arg1: i32, %arg2: memref<1x32x256xf32, #tpu.memory_space<vmem>>, %arg3: memref<3x32x32xbf16, #tpu.memory_space<vmem>>, %arg4: memref<3x32x1xf32, #tpu.memory_space<vmem>>, %arg5: memref<3x32x32xbf16, #tpu.memory_space<vmem>>, %arg6: memref<3x32x1xf32, #tpu.memory_space<vmem>>, %arg7: memref<32x32xbf16, #tpu.memory_space<vmem>>, %arg8: memref<32x1xf32, #tpu.memory_space<vmem>>, %arg9: memref<1x32x256xf32, #tpu.memory_space<vmem>>) attributes {dimension_semantics = [#tpu.dimension_semantics<parallel>, #tpu.dimension_semantics<parallel>], iteration_bounds = array<i64: 2, 1>, scalar_prefetch = 0 : i64, scratch_operands = 0 : i64, tpu.core_type = #tpu.core_type<tc>, window_params = [{transform_indices = @transform_0, window_bounds = array<i64: 1, 32, 256>}, {pipeline_mode = #tpu.pipeline_mode<synchronous>, transform_indices = @transform_1, window_bounds = array<i64: 3, 32, 32>}, {pipeline_mode = #tpu.pipeline_mode<synchronous>, transform_indices = @transform_2, window_bounds = array<i64: 3, 32, 1>}, {pipeline_mode = #tpu.pipeline_mode<synchronous>, transform_indices = @transform_3, window_bounds = array<i64: 3, 32, 32>}, {pipeline_mode = #tpu.pipeline_mode<synchronous>, transform_indices = @transform_4, window_bounds = array<i64: 3, 32, 1>}, {pipeline_mode = #tpu.pipeline_mode<synchronous>, transform_indices = @transform_5, window_bounds = array<i64: 32, 32>}, {pipeline_mode = #tpu.pipeline_mode<synchronous>, transform_indices = @transform_6, window_bounds = array<i64: 32, 1>}, {transform_indices = @transform_7, window_bounds = array<i64: 1, 32, 256>}]} {
    %c0 = arith.constant 0 : index
    %c0_0 = arith.constant 0 : index
    %c0_1 = arith.constant 0 : index
    %0 = vector.load %arg2[%c0, %c0_0, %c0_1] : memref<1x32x256xf32, #tpu.memory_space<vmem>>, vector<1x32x256xf32>
    %1 = vector.shape_cast %0 : vector<1x32x256xf32> to vector<32x256xf32>
    %c0_2 = arith.constant 0 : index
    %c0_3 = arith.constant 0 : index
    %c0_4 = arith.constant 0 : index
    %2 = vector.load %arg3[%c0_2, %c0_3, %c0_4] : memref<3x32x32xbf16, #tpu.memory_space<vmem>>, vector<1x32x32xbf16>
    %3 = vector.shape_cast %2 : vector<1x32x32xbf16> to vector<32x32xbf16>
    %4 = arith.truncf %1 : vector<32x256xf32> to vector<32x256xbf16>
    %cst = arith.constant dense<0.000000e+00> : vector<32x256xf32>
    %5 = tpu.matmul %3, %4, %cst {dimension_numbers = #tpu.dot_dimension_numbers<[1], [0], [0], [1], [0, 0, 1, 1], [], []>} : vector<32x32xbf16>, vector<32x256xbf16>, vector<32x256xf32> -> vector<32x256xf32>
    %c0_5 = arith.constant 0 : index
    %c0_6 = arith.constant 0 : index
    %c0_7 = arith.constant 0 : index
    %6 = vector.load %arg4[%c0_5, %c0_6, %c0_7] : memref<3x32x1xf32, #tpu.memory_space<vmem>>, vector<1x32x1xf32>
    %7 = vector.shape_cast %6 : vector<1x32x1xf32> to vector<32x1xf32>
    %8 = vector.broadcast %7 : vector<32x1xf32> to vector<32x256xf32>
    %9 = arith.addf %5, %8 : vector<32x256xf32>
    %cst_8 = arith.constant 2.000000e-01 : f32
    %10 = vector.broadcast %cst_8 : f32 to vector<32x256xf32>
    %11 = arith.mulf %10, %9 : vector<32x256xf32>
    %12 = arith.maximumf %9, %11 : vector<32x256xf32>
    %c0_9 = arith.constant 0 : index
    %c0_10 = arith.constant 0 : index
    %c0_11 = arith.constant 0 : index
    %13 = vector.load %arg5[%c0_9, %c0_10, %c0_11] : memref<3x32x32xbf16, #tpu.memory_space<vmem>>, vector<1x32x32xbf16>
    %14 = vector.shape_cast %13 : vector<1x32x32xbf16> to vector<32x32xbf16>
    %15 = arith.truncf %12 : vector<32x256xf32> to vector<32x256xbf16>
    %cst_12 = arith.constant dense<0.000000e+00> : vector<32x256xf32>
    %16 = tpu.matmul %14, %15, %cst_12 {dimension_numbers = #tpu.dot_dimension_numbers<[1], [0], [0], [1], [0, 0, 1, 1], [], []>} : vector<32x32xbf16>, vector<32x256xbf16>, vector<32x256xf32> -> vector<32x256xf32>
    %c0_13 = arith.constant 0 : index
    %c0_14 = arith.constant 0 : index
    %c0_15 = arith.constant 0 : index
    %17 = vector.load %arg6[%c0_13, %c0_14, %c0_15] : memref<3x32x1xf32, #tpu.memory_space<vmem>>, vector<1x32x1xf32>
    %18 = vector.shape_cast %17 : vector<1x32x1xf32> to vector<32x1xf32>
    %19 = vector.broadcast %18 : vector<32x1xf32> to vector<32x256xf32>
    %20 = arith.addf %16, %19 : vector<32x256xf32>
    %cst_16 = arith.constant 2.000000e-01 : f32
    %21 = vector.broadcast %cst_16 : f32 to vector<32x256xf32>
    %22 = arith.mulf %21, %20 : vector<32x256xf32>
    %23 = arith.maximumf %20, %22 : vector<32x256xf32>
    %24 = arith.addf %1, %23 : vector<32x256xf32>
    %c1 = arith.constant 1 : index
    %c0_17 = arith.constant 0 : index
    %c0_18 = arith.constant 0 : index
    %25 = vector.load %arg3[%c1, %c0_17, %c0_18] : memref<3x32x32xbf16, #tpu.memory_space<vmem>>, vector<1x32x32xbf16>
    %26 = vector.shape_cast %25 : vector<1x32x32xbf16> to vector<32x32xbf16>
    %27 = arith.truncf %24 : vector<32x256xf32> to vector<32x256xbf16>
    %cst_19 = arith.constant dense<0.000000e+00> : vector<32x256xf32>
    %28 = tpu.matmul %26, %27, %cst_19 {dimension_numbers = #tpu.dot_dimension_numbers<[1], [0], [0], [1], [0, 0, 1, 1], [], []>} : vector<32x32xbf16>, vector<32x256xbf16>, vector<32x256xf32> -> vector<32x256xf32>
    %c1_20 = arith.constant 1 : index
    %c0_21 = arith.constant 0 : index
    %c0_22 = arith.constant 0 : index
    %29 = vector.load %arg4[%c1_20, %c0_21, %c0_22] : memref<3x32x1xf32, #tpu.memory_space<vmem>>, vector<1x32x1xf32>
    %30 = vector.shape_cast %29 : vector<1x32x1xf32> to vector<32x1xf32>
    %31 = vector.broadcast %30 : vector<32x1xf32> to vector<32x256xf32>
    %32 = arith.addf %28, %31 : vector<32x256xf32>
    %cst_23 = arith.constant 2.000000e-01 : f32
    %33 = vector.broadcast %cst_23 : f32 to vector<32x256xf32>
    %34 = arith.mulf %33, %32 : vector<32x256xf32>
    %35 = arith.maximumf %32, %34 : vector<32x256xf32>
    %c1_24 = arith.constant 1 : index
    %c0_25 = arith.constant 0 : index
    %c0_26 = arith.constant 0 : index
    %36 = vector.load %arg5[%c1_24, %c0_25, %c0_26] : memref<3x32x32xbf16, #tpu.memory_space<vmem>>, vector<1x32x32xbf16>
    %37 = vector.shape_cast %36 : vector<1x32x32xbf16> to vector<32x32xbf16>
    %38 = arith.truncf %35 : vector<32x256xf32> to vector<32x256xbf16>
    %cst_27 = arith.constant dense<0.000000e+00> : vector<32x256xf32>
    %39 = tpu.matmul %37, %38, %cst_27 {dimension_numbers = #tpu.dot_dimension_numbers<[1], [0], [0], [1], [0, 0, 1, 1], [], []>} : vector<32x32xbf16>, vector<32x256xbf16>, vector<32x256xf32> -> vector<32x256xf32>
    %c1_28 = arith.constant 1 : index
    %c0_29 = arith.constant 0 : index
    %c0_30 = arith.constant 0 : index
    %40 = vector.load %arg6[%c1_28, %c0_29, %c0_30] : memref<3x32x1xf32, #tpu.memory_space<vmem>>, vector<1x32x1xf32>
    %41 = vector.shape_cast %40 : vector<1x32x1xf32> to vector<32x1xf32>
    %42 = vector.broadcast %41 : vector<32x1xf32> to vector<32x256xf32>
    %43 = arith.addf %39, %42 : vector<32x256xf32>
    %cst_31 = arith.constant 2.000000e-01 : f32
    %44 = vector.broadcast %cst_31 : f32 to vector<32x256xf32>
    %45 = arith.mulf %44, %43 : vector<32x256xf32>
    %46 = arith.maximumf %43, %45 : vector<32x256xf32>
    %47 = arith.addf %24, %46 : vector<32x256xf32>
    %c2 = arith.constant 2 : index
    %c0_32 = arith.constant 0 : index
    %c0_33 = arith.constant 0 : index
    %48 = vector.load %arg3[%c2, %c0_32, %c0_33] : memref<3x32x32xbf16, #tpu.memory_space<vmem>>, vector<1x32x32xbf16>
    %49 = vector.shape_cast %48 : vector<1x32x32xbf16> to vector<32x32xbf16>
    %50 = arith.truncf %47 : vector<32x256xf32> to vector<32x256xbf16>
    %cst_34 = arith.constant dense<0.000000e+00> : vector<32x256xf32>
    %51 = tpu.matmul %49, %50, %cst_34 {dimension_numbers = #tpu.dot_dimension_numbers<[1], [0], [0], [1], [0, 0, 1, 1], [], []>} : vector<32x32xbf16>, vector<32x256xbf16>, vector<32x256xf32> -> vector<32x256xf32>
    %c2_35 = arith.constant 2 : index
    %c0_36 = arith.constant 0 : index
    %c0_37 = arith.constant 0 : index
    %52 = vector.load %arg4[%c2_35, %c0_36, %c0_37] : memref<3x32x1xf32, #tpu.memory_space<vmem>>, vector<1x32x1xf32>
    %53 = vector.shape_cast %52 : vector<1x32x1xf32> to vector<32x1xf32>
    %54 = vector.broadcast %53 : vector<32x1xf32> to vector<32x256xf32>
    %55 = arith.addf %51, %54 : vector<32x256xf32>
    %cst_38 = arith.constant 2.000000e-01 : f32
    %56 = vector.broadcast %cst_38 : f32 to vector<32x256xf32>
    %57 = arith.mulf %56, %55 : vector<32x256xf32>
    %58 = arith.maximumf %55, %57 : vector<32x256xf32>
    %c2_39 = arith.constant 2 : index
    %c0_40 = arith.constant 0 : index
    %c0_41 = arith.constant 0 : index
    %59 = vector.load %arg5[%c2_39, %c0_40, %c0_41] : memref<3x32x32xbf16, #tpu.memory_space<vmem>>, vector<1x32x32xbf16>
    %60 = vector.shape_cast %59 : vector<1x32x32xbf16> to vector<32x32xbf16>
    %61 = arith.truncf %58 : vector<32x256xf32> to vector<32x256xbf16>
    %cst_42 = arith.constant dense<0.000000e+00> : vector<32x256xf32>
    %62 = tpu.matmul %60, %61, %cst_42 {dimension_numbers = #tpu.dot_dimension_numbers<[1], [0], [0], [1], [0, 0, 1, 1], [], []>} : vector<32x32xbf16>, vector<32x256xbf16>, vector<32x256xf32> -> vector<32x256xf32>
    %c2_43 = arith.constant 2 : index
    %c0_44 = arith.constant 0 : index
    %c0_45 = arith.constant 0 : index
    %63 = vector.load %arg6[%c2_43, %c0_44, %c0_45] : memref<3x32x1xf32, #tpu.memory_space<vmem>>, vector<1x32x1xf32>
    %64 = vector.shape_cast %63 : vector<1x32x1xf32> to vector<32x1xf32>
    %65 = vector.broadcast %64 : vector<32x1xf32> to vector<32x256xf32>
    %66 = arith.addf %62, %65 : vector<32x256xf32>
    %cst_46 = arith.constant 2.000000e-01 : f32
    %67 = vector.broadcast %cst_46 : f32 to vector<32x256xf32>
    %68 = arith.mulf %67, %66 : vector<32x256xf32>
    %69 = arith.maximumf %66, %68 : vector<32x256xf32>
    %70 = arith.addf %47, %69 : vector<32x256xf32>
    %c0_47 = arith.constant 0 : index
    %c0_48 = arith.constant 0 : index
    %71 = vector.load %arg7[%c0_47, %c0_48] : memref<32x32xbf16, #tpu.memory_space<vmem>>, vector<32x32xbf16>
    %72 = arith.truncf %70 : vector<32x256xf32> to vector<32x256xbf16>
    %cst_49 = arith.constant dense<0.000000e+00> : vector<32x256xf32>
    %73 = tpu.matmul %71, %72, %cst_49 {dimension_numbers = #tpu.dot_dimension_numbers<[1], [0], [0], [1], [0, 0, 1, 1], [], []>} : vector<32x32xbf16>, vector<32x256xbf16>, vector<32x256xf32> -> vector<32x256xf32>
    %c0_50 = arith.constant 0 : index
    %c0_51 = arith.constant 0 : index
    %74 = vector.load %arg8[%c0_50, %c0_51] : memref<32x1xf32, #tpu.memory_space<vmem>>, vector<32x1xf32>
    %75 = vector.broadcast %74 : vector<32x1xf32> to vector<32x256xf32>
    %76 = arith.addf %73, %75 : vector<32x256xf32>
    %c0_52 = arith.constant 0 : index
    %c0_53 = arith.constant 0 : index
    %c0_54 = arith.constant 0 : index
    %77 = vector.load %arg9[%c0_52, %c0_53, %c0_54] : memref<1x32x256xf32, #tpu.memory_space<vmem>>, vector<1x32x256xf32>
    %78 = vector.shape_cast %77 : vector<1x32x256xf32> to vector<32x256xf32>
    %79 = vector.shape_cast %76 : vector<32x256xf32> to vector<1x32x256xf32>
    tpu.vector_store %arg9[%c0_52, %c0_53, %c0_54], %79 {strides = array<i32>} : memref<1x32x256xf32, #tpu.memory_space<vmem>>, vector<1x32x256xf32>,
    return
  }
  func.func @transform_0(%arg0: i32, %arg1: i32) -> (i32, i32, i32) {
    %c0_i32 = arith.constant 0 : i32
    %c0_i32_0 = arith.constant 0 : i32
    return %arg0, %c0_i32, %arg1 : i32, i32, i32
  }
  func.func @transform_1(%arg0: i32, %arg1: i32) -> (i32, i32, i32) {
    %c0_i32 = arith.constant 0 : i32
    %c0_i32_0 = arith.constant 0 : i32
    %c0_i32_1 = arith.constant 0 : i32
    %c0_i32_2 = arith.constant 0 : i32
    return %c0_i32, %c0_i32_0, %c0_i32_1 : i32, i32, i32
  }
  func.func @transform_2(%arg0: i32, %arg1: i32) -> (i32, i32, i32) {
    %c0_i32 = arith.constant 0 : i32
    %c0_i32_0 = arith.constant 0 : i32
    %c0_i32_1 = arith.constant 0 : i32
    %c0_i32_2 = arith.constant 0 : i32
    return %c0_i32, %c0_i32_0, %c0_i32_1 : i32, i32, i32
  }
  func.func @transform_3(%arg0: i32, %arg1: i32) -> (i32, i32, i32) {
    %c0_i32 = arith.constant 0 : i32
    %c0_i32_0 = arith.constant 0 : i32
    %c0_i32_1 = arith.constant 0 : i32
    %c0_i32_2 = arith.constant 0 : i32
    return %c0_i32, %c0_i32_0, %c0_i32_1 : i32, i32, i32
  }
  func.func @transform_4(%arg0: i32, %arg1: i32) -> (i32, i32, i32) {
    %c0_i32 = arith.constant 0 : i32
    %c0_i32_0 = arith.constant 0 : i32
    %c0_i32_1 = arith.constant 0 : i32
    %c0_i32_2 = arith.constant 0 : i32
    return %c0_i32, %c0_i32_0, %c0_i32_1 : i32, i32, i32
  }
  func.func @transform_5(%arg0: i32, %arg1: i32) -> (i32, i32) {
    %c0_i32 = arith.constant 0 : i32
    %c0_i32_0 = arith.constant 0 : i32
    %c0_i32_1 = arith.constant 0 : i32
    return %c0_i32, %c0_i32_0 : i32, i32
  }
  func.func @transform_6(%arg0: i32, %arg1: i32) -> (i32, i32) {
    %c0_i32 = arith.constant 0 : i32
    %c0_i32_0 = arith.constant 0 : i32
    %c0_i32_1 = arith.constant 0 : i32
    return %c0_i32, %c0_i32_0 : i32, i32
  }
  func.func @transform_7(%arg0: i32, %arg1: i32) -> (i32, i32, i32) {
    %c0_i32 = arith.constant 0 : i32
    %c0_i32_0 = arith.constant 0 : i32
    return %arg0, %c0_i32, %arg1 : i32, i32, i32
  }
}

</mosaic_0001>

<bundles_post_ra>
// kernel: tpu_custom_call.1
= control target key start
LH: loop header
LB: loop body
LE: loop exit
PB: predicated region body
PF: predicated region fallthrough
CT: control target
= control target key end

     0   :  { %12 = vsyncpa [#allocation3], 0  ;;  %s1904_s0 = inlined_call_operand.vmem [shape: f32[2,32,256], index: 0, kind: input, shape index: {}]   ;;  %s1905_s1 = inlined_call_operand.vmem [shape: bf16[3,32,32], index: 1, kind: input, shape index: {}]   ;;  %s1906_s2 = inlined_call_operand.vmem [shape: f32[3,32,1], index: 2, kind: input, shape index: {}]   ;;  %s1907_s3 = inlined_call_operand.vmem [shape: bf16[3,32,32], index: 3, kind: input, shape index: {}]   ;;  %s1908_s4 = inlined_call_operand.vmem [shape: f32[3,32,1], index: 4, kind: input, shape index: {}]   ;;  %s1909_s5 = inlined_call_operand.vmem [shape: bf16[32,32], index: 5, kind: input, shape index: {}]   ;;  %s1910_s6 = inlined_call_operand.vmem [shape: f32[32,1], index: 6, kind: input, shape index: {}]   ;;  %s1911_s7 = inlined_call_operand.hbm [shape: f32[2,32,256], index: 7, kind: output, shape index: {}]  }
   0x1   :  { %14 = vsyncpa [#allocation3 + $0x1], 0  ;;  %s1533_s24 = smov 0   ;;  %s1535_s25 = smov 0  }
   0x2   :  { %s1537_s26 = smov 0   ;;  %s1539_s27 = smov 0  }
   0x3   :  { %s1541_s28 = smov 0   ;;  %s1543_s29 = smov 0  }
   0x4 LB: > { %s1256_s30 = sadd.s32 4294967295, %s1487_s29   ;;  %s1257_s8 = sadd.s32 4294967294, %s1487_s29   ;;  %s1487_s29 = sphi %s1543_s29, %s20_s29   ;;  %s1483_s28 = sphi %s1541_s28, %s1918_s28   ;;  %s1479_s27 = sphi %s1539_s27, %s1917_s27   ;;  %s1475_s26 = sphi %s1537_s26, %s1916_s26   ;;  %s1471_s25 = sphi %s1535_s25, %s1915_s25   ;;  %s1467_s24 = sphi %s1533_s24, %s1914_s24  }
   0x5   : > { %s32_s9 = sadd.s32 1, %s1483_s28  ;;  %s195_s10 = sadd.s32 1, %s1475_s26 }
   0x6   : > { %p34_p0 = scmp.ge.s32.totalorder %s32_s9, 2  ;;  %p205_p1 = scmp.ne.s32.totalorder %s1475_s26, %s1471_s25 }
   0x7   : > { %p206_p2 = scmp.eq.s32.totalorder %s1256_s30, 1  ;;  %p211_p3 = scmp.ne.s32.totalorder %s1471_s25, %s1467_s24 }
   0x8   : > { %s1920_s9 = smov (%p34_p0, %s32_s9), 0  ;;  %p212_p5 = scmp.eq.s32.totalorder %s1257_s8, 1 }
   0x9   : > { %p1573_p4 = por %p206_p2, %p205_p1  ;;  %s190_s12 = ssub.s32 %s1483_s28, %s1920_s9 }
   0xa   : > { %p1260_p6 = scmp.ge.s32.totalorder %s1487_s29, 1  ;;  %p193_p7 = scmp.eq.s32.totalorder %s190_s12, 0 }
   0xb   : > { %p1580_p8 = por %p212_p5, %p211_p3  ;;  %p261_p9 = scmp.lt.s32.totalorder %s1487_s29, 3 }
   0xc   : > { %s1586_s14 = scalar_select %p193_p7, %s1475_s26, %s195_s10  }
   0xd   : > { %p262_p10 = pnand %p1260_p6, %p261_p9 }
   0xe   : > { %p298_p11 = scmp.lt.s32.totalorder (!%p262_p10), %s1479_s27, 1  ;;  %v1489_v0 = vmov (!%p262_p10), 0   ;;  %v325_v1 = vld [vmem:[%s1906_s2] sm:$0xff] (!%p262_p10)  ;;  %v327_v2 = vld [vmem:[%s1906_s2 + $0x10] sm:$0xff] (!%p262_p10)  ;;  %v326_v3 = vld [vmem:[%s1906_s2 + $0x8] sm:$0xff] (!%p262_p10)  ;;  %vm359_vm0 = vcmask (!%p262_p10), 261120  }
   0xf   : > { %265 = sbr.rel (%p262_p10) target bundleno = 1689 (0x699), region = 48  ;;  %398 = vmatprep.mubr.bf16.mxu0 (!%p262_p10), %v1489_v0  ;;  %408 = vmatprep.mubr.bf16.mxu1 (!%p262_p10), %v1489_v0  ;;  %v328_v4 = vld [vmem:[%s1906_s2 + $0x18] sm:$0xff] (!%p262_p10)  ;;  %v443_v16 = vld [vmem:[%s1908_s4] sm:$0xff] (!%p262_p10)  ;;  %v444_v17 = vld [vmem:[%s1908_s4 + $0x8] sm:$0xff] (!%p262_p10)  ;;  %s294_s10 = sand.u32 (!%p262_p10), 1, %s1471_s25  }
  0x10   : > { %1393 = vset.pattern.permute.xlu0 (!%p262_p10), %v1489_v0  ;;  %1394 = vset.pattern.permute.xlu1 (!%p262_p10), %v1489_v0  ;;  %v1395_v19 = vld [vmem:[%s1905_s1] sm:$0xff] (!%p262_p10)   ;;  %v1396_v20 = vld [vmem:[%s1905_s1 + $0x8] sm:$0xff] (!%p262_p10)   ;;  %v445_v21 = vld [vmem:[%s1908_s4 + $0x10] sm:$0xff] (!%p262_p10)  ;;  %s1330_s16 = sshll.u32 (!%p262_p10), %s1479_s27, 10  ;;  %s1490_s22 = smov (!%p262_p10), [#allocation2]  }
  0x11   : > { %331 = vperm.xlu0 (!%p262_p10), %1393, %v325_v1   ;;  %341 = vperm.xlu1 (!%p262_p10), %1394, %v327_v2   ;;  %v446_v22 = vld [vmem:[%s1908_s4 + $0x18] sm:$0xff] (!%p262_p10)  ;;  %v1276_v23 = vld [vmem:[%s1906_s2 + $0x20] sm:$0xff] (!%p262_p10)  ;;  %v1277_v24 = vld [vmem:[%s1906_s2 + $0x28] sm:$0xff] (!%p262_p10)  ;;  %s1413_s23 = sshll.u32 (!%p262_p10), %s1490_s22, 4  ;;  %s1414_s23 = int_to_ptr.vmem [resolvable:$false] %s1413_s23 }
  0x12   : > { %v1278_v25 = vld [vmem:[%s1906_s2 + $0x30] sm:$0xff] (!%p262_p10)  ;;  %v1279_v26 = vld [vmem:[%s1906_s2 + $0x38] sm:$0xff] (!%p262_p10)  ;;  %v1288_v27 = vld [vmem:[%s1908_s4 + $0x20] sm:$0xff] (!%p262_p10)  ;;  %s1415_s30 = scalar_lea.vmem (!%p262_p10), %s1414_s23, 2048 }
  0x13   : > { %v1289_v28 = vld [vmem:[%s1908_s4 + $0x28] sm:$0xff] (!%p262_p10)  ;;  %v1290_v29 = vld [vmem:[%s1908_s4 + $0x30] sm:$0xff] (!%p262_p10)  ;;  %v1291_v30 = vld [vmem:[%s1908_s4 + $0x38] sm:$0xff] (!%p262_p10) }
  0x14   : > { %v1300_v31 = vld [vmem:[%s1906_s2 + $0x40] sm:$0xff] (!%p262_p10)  ;;  %v1301_v32 = vld [vmem:[%s1906_s2 + $0x48] sm:$0xff] (!%p262_p10)  ;;  %v1302_v33 = vld [vmem:[%s1906_s2 + $0x50] sm:$0xff] (!%p262_p10) }
  0x15   : > { %336 = vperm.xlu0 (!%p262_p10), %1393, %v326_v3   ;;  %346 = vperm.xlu1 (!%p262_p10), %1394, %v328_v4   ;;  %v1303_v34 = vld [vmem:[%s1906_s2 + $0x58] sm:$0xff] (!%p262_p10)  ;;  %v1312_v35 = vld [vmem:[%s1908_s4 + $0x40] sm:$0xff] (!%p262_p10)  ;;  %v1313_v36 = vld [vmem:[%s1908_s4 + $0x48] sm:$0xff] (!%p262_p10) }
  0x16   : > { %s299_s15 = scalar_select %p298_p11, %s1479_s27, 1  ;;  %v1314_v37 = vld [vmem:[%s1908_s4 + $0x50] sm:$0xff]  ;;  %v1315_v38 = vld [vmem:[%s1908_s4 + $0x58] sm:$0xff]  ;;  %v1060_v39 = vld [vmem:[%s1910_s6] sm:$0xff] }
  0x17   : > { %v1061_v40 = vld [vmem:[%s1910_s6 + $0x8] sm:$0xff]  ;;  %v1062_v41 = vld [vmem:[%s1910_s6 + $0x10] sm:$0xff]  ;;  %v1063_v42 = vld [vmem:[%s1910_s6 + $0x18] sm:$0xff]  ;;  %s1858_s27 = scalar_lea.sflag [#allocation3], %s294_s10 }
  0x18   : > { %s1329_s20 = sshll.u32 %s299_s15, 6 }
  0x19   : > { %s305_s12 = scalar_lea.vmem %s1904_s0, %s1329_s20  ;;  %449 = vperm.xlu0 %1393, %v443_v16   ;;  %454 = vperm.xlu1 %1394, %v444_v17   ;;  %s1852_s20 = scalar_lea.hbm %s1911_s7, %s1330_s16 }
  0x1a   : > { %v1609_v5 = vld [vmem:[%s305_s12 + $0x8] sm:$0xff]  ;;  %v1611_v6 = vld [vmem:[%s305_s12 + $0x18] sm:$0xff]  ;;  %v1613_v7 = vld [vmem:[%s305_s12] sm:$0xff] }
  0x1b   : > { %v322_v8 = vpack.c.bf16 %v1611_v6, %v1609_v5  ;;  %v1617_v9 = vld [vmem:[%s305_s12 + $0x10] sm:$0xff]  ;;  %v1619_v10 = vld [vmem:[%s305_s12 + $0x28] sm:$0xff]  ;;  %v1621_v11 = vld [vmem:[%s305_s12 + $0x38] sm:$0xff] }
  0x1c   : > { %v321_v12 = vpack.c.bf16 %v1617_v9, %v1613_v7  ;;  %v324_v13 = vpack.c.bf16 %v1621_v11, %v1619_v10  ;;  %v1627_v14 = vld [vmem:[%s305_s12 + $0x20] sm:$0xff]  ;;  %v1629_v15 = vld [vmem:[%s305_s12 + $0x30] sm:$0xff]  ;;  %s1261_s12 = sshll.u32 %s294_s10, 6 }
  0x1d   : > { %366 = vmatprep.subr.bf16.mxu0 %v322_v8  ;;  %1331 = vmatprep.subr.bf16.mxu1 %v322_v8  ;;  %v323_v18 = vpack.c.bf16 %v1629_v15, %v1627_v14  ;;  %s296_s15 = scalar_lea.vmem [#allocation2], %s1261_s12 }
  0x1e   : > { %367 = vmatpush1.bf16.msra.mxu0 %v321_v12  ;;  %1333 = vmatpush1.bf16.msra.mxu1 %v321_v12  ;;  %s1177_s17 = sshll.u32 %s296_s15, 4  ;;  %s1854_s17 = int_to_ptr.vmem [resolvable:$true] %s1177_s17 }
  0x1f   : > { %368 = vmatprep.subr.bf16.mxu0 %v324_v13  ;;  %1332 = vmatprep.subr.bf16.mxu1 %v324_v13  ;;  %s1409_s21 = scalar_lea.vmem %s1854_s17, 1024  ;;  %p1416_p1 = scmp.lt.s32.totalorder %s1854_s17, %s1414_s23 }
  0x20   : > { %459 = vperm.xlu0 %1393, %v445_v21   ;;  %464 = vperm.xlu1 %1394, %v446_v22   ;;  %p1410_p12 = scmp.ne.s32.totalorder %s1854_s17, %s1409_s21  ;;  %p1417_p2 = scmp.lt.s32.totalorder %s1415_s30, %s1409_s21 }
  0x22   : > { %369 = vmatpush1.bf16.msra.mxu0 %v323_v18  ;;  %1334 = vmatpush1.bf16.msra.mxu1 %v323_v18  ;;  %p1411_p13 = pnand %p1410_p12, %p1573_p4  ;;  %p1418_p3 = por %p1417_p2, %p1416_p1 }
  0x24   : > { %576 = vperm.xlu0 %1393, %v1276_v23   ;;  %581 = vperm.xlu1 %1394, %v1277_v24   ;;  %p1412_p0 = pneg %p1411_p13 }
  0x25   : > { %1266 = vmatmul.mubr.msk.bf16.vlgmr.msra.gmra.mrb[0].mxu0 %vm359_vm0, %v1395_v19  ;;  %1267 = vmatmul.mubr.msk.bf16.vlgmr.msra.gmra.mrb[0].mxu1 %vm359_vm0, %v1396_v20 }
  0x26   : > { %515 = vmatprep.mubr.bf16.mxu1 %v1489_v0  ;;  %642 = vmatprep.mubr.bf16.mxu0 %v1489_v0  ;;  %p1419_p5 = pnand %p1418_p3, %p1412_p0 }
  0x28   : > { %586 = vperm.xlu0 %1393, %v1278_v25   ;;  %591 = vperm.xlu1 %1394, %v1279_v26  }
  0x2c   : > { %695 = vperm.xlu0 %1393, %v1288_v27   ;;  %700 = vperm.xlu1 %1394, %v1289_v28   ;;  %v1397_v28 = vld [vmem:[%s1907_s3] sm:$0xff]  }
  0x30   : > { %705 = vperm.xlu0 %1393, %v1290_v29   ;;  %710 = vperm.xlu1 %1394, %v1291_v30   ;;  %v1398_v29 = vld [vmem:[%s1907_s3 + $0x8] sm:$0xff]  }
  0x34   : > { %822 = vperm.xlu0 %1393, %v1300_v31   ;;  %827 = vperm.xlu1 %1394, %v1301_v32  }
  0x38   : > { %832 = vperm.xlu0 %1393, %v1302_v33   ;;  %837 = vperm.xlu1 %1394, %v1303_v34  }
  0x3c   : > { %941 = vperm.xlu0 %1393, %v1312_v35   ;;  %946 = vperm.xlu1 %1394, %v1313_v36  }
  0x40   : > { %951 = vperm.xlu0 %1393, %v1314_v37   ;;  %956 = vperm.xlu1 %1394, %v1315_v38  }
  0x44   : > { %1066 = vperm.xlu0 %1393, %v1060_v39   ;;  %1071 = vperm.xlu1 %1394, %v1061_v40  }
  0x48   : > { %1076 = vperm.xlu0 %1393, %v1062_v41   ;;  %1081 = vperm.xlu1 %1394, %v1063_v42  }
  0x90   : > { %v332_v43 = vpop.permute.xlu0 %331  ;;  %v342_v44 = vpop.permute.xlu1 %341 }
  0x94   : > { %v337_v45 = vpop.permute.xlu0 %336  ;;  %v347_v46 = vpop.permute.xlu1 %346 }
  0x98   : > { %v450_v30 = vpop.permute.xlu0 %449  ;;  %v455_v34 = vpop.permute.xlu1 %454 }
  0xf8   : > { %v400_v47 = vpop.f32.mrb[0].mxu0  ;;  %v410_v48 = vpop.f32.mrb[0].mxu1 }
  0xf9   : > { %v401_v49 = vadd.f32 %v400_v47, %v332_v43  ;;  %v411_v50 = vadd.f32 %v410_v48, %v342_v44  ;;  %v402_v51 = vpop.f32.mrb[1].mxu0  ;;  %v412_v52 = vpop.f32.mrb[1].mxu1 }
  0xfa   : > { %v403_v53 = vadd.f32 %v402_v51, %v332_v43  ;;  %v413_v54 = vadd.f32 %v412_v52, %v342_v44  ;;  %v404_v55 = vpop.f32.mrb[2].mxu0  ;;  %v414_v56 = vpop.f32.mrb[2].mxu1 }
  0xfb   : > { %v419_v57 = vmul.f32 0.2, %v401_v49  ;;  %v423_v58 = vmul.f32 0.2, %v411_v50  ;;  %v405_v59 = vadd.f32 %v404_v55, %v337_v45  ;;  %v415_v60 = vadd.f32 %v414_v56, %v347_v46  ;;  %v406_v61 = vpop.f32.mrb[3].mxu0  ;;  %v416_v62 = vpop.f32.mrb[3].mxu1 }
  0xfc   : > { %v420_v63 = vmul.f32 0.2, %v403_v53  ;;  %v424_v1 = vmul.f32 0.2, %v413_v54  ;;  %v407_v2 = vadd.f32 %v406_v61, %v337_v45  ;;  %v417_v3 = vadd.f32 %v416_v62, %v347_v46  ;;  %v460_v47 = vpop.permute.xlu0 %459 }
  0xfd   : > { %v431_v4 = vmax.f32 %v411_v50, %v423_v58  ;;  %v421_v8 = vmul.f32 0.2, %v405_v59  ;;  %v425_v12 = vmul.f32 0.2, %v415_v60  ;;  %v427_v17 = vmax.f32 %v401_v49, %v419_v57 }
  0xfe   : > { %v422_v13 = vmul.f32 0.2, %v407_v2  ;;  %v426_v16 = vmul.f32 0.2, %v417_v3  ;;  %v428_v20 = vmax.f32 %v403_v53, %v420_v63  ;;  %v432_v21 = vmax.f32 %v413_v54, %v424_v1  ;;  %v465_v53 = vpop.permute.xlu1 %464 }
  0xff   : > { %v429_v18 = vmax.f32 %v405_v59, %v421_v8  ;;  %v433_v19 = vmax.f32 %v415_v60, %v425_v12 }
 0x100   : > { %v430_v22 = vmax.f32 %v407_v2, %v422_v13  ;;  %v434_v23 = vmax.f32 %v417_v3, %v426_v16 }
 0x101   : > { %v439_v24 = vpack.c.bf16 %v429_v18, %v427_v17  ;;  %v441_v25 = vpack.c.bf16 %v433_v19, %v431_v4 }
 0x102   : > { %v440_v26 = vpack.c.bf16 %v430_v22, %v428_v20  ;;  %v442_v27 = vpack.c.bf16 %v434_v23, %v432_v21  ;;  %v582_v21 = vpop.permute.xlu1 %581 }
 0x104   : > { %483 = vmatprep.subr.bf16.mxu1 %v440_v26 }
 0x105   : > { %484 = vmatpush1.bf16.msra.mxu1 %v439_v24 }
 0x106   : > { %485 = vmatprep.subr.bf16.mxu1 %v442_v27 }
 0x109   : > { %486 = vmatpush1.bf16.msra.mxu1 %v441_v25 }
 0x10c   : > { %1270 = vmatmul.mubr.msk.bf16.vlgmr.msra.gmra.mrb[4].mxu1 %vm359_vm0, %v1397_v28 }
 0x10d   : > { %525 = vmatprep.mubr.bf16.mxu1 %v1489_v0 }
 0x114   : > { %1271 = vmatmul.mubr.msk.bf16.gmra.mrb[8].mxu1 %vm359_vm0, %v1398_v29 }
 0x115   : > { %761 = vmatprep.mubr.bf16.mxu1 %v1489_v0 }
 0x1df   : > { %v517_v31 = vpop.f32.mrb[4].mxu1 }
 0x1e0   : > { %v518_v32 = vadd.f32 %v517_v31, %v450_v30  ;;  %v519_v33 = vpop.f32.mrb[5].mxu1 }
 0x1e1   : > { %v520_v35 = vadd.f32 %v519_v33, %v450_v30  ;;  %v521_v36 = vpop.f32.mrb[6].mxu1 }
 0x1e2   : > { %v536_v37 = vmul.f32 0.2, %v518_v32  ;;  %v522_v38 = vadd.f32 %v521_v36, %v455_v34  ;;  %v523_v39 = vpop.f32.mrb[7].mxu1 }
 0x1e3   : > { %v537_v40 = vmul.f32 0.2, %v520_v35  ;;  %v524_v41 = vadd.f32 %v523_v39, %v455_v34 }
 0x1e4   : > { %v538_v42 = vmul.f32 0.2, %v522_v38  ;;  %v544_v45 = vmax.f32 %v518_v32, %v536_v37 }
 0x1e5   : > { %v545_v43 = vmax.f32 %v520_v35, %v537_v40  ;;  %v539_v44 = vmul.f32 0.2, %v524_v41  ;;  %v592_v40 = vpop.permute.xlu1 %591 }
 0x1e6   : > { %v546_v46 = vmax.f32 %v522_v38, %v538_v42  ;;  %v1735_v58 = vadd.f32 %v544_v45, %v1613_v7 }
 0x1e7   : > { %v547_v48 = vmax.f32 %v524_v41, %v539_v44  ;;  %v527_v49 = vpop.f32.mrb[8].mxu1  ;;  %v1729_v54 = vadd.f32 %v545_v43, %v1609_v5 }
 0x1e8   : > { %v1726_v50 = vadd.f32 %v546_v46, %v1617_v9  ;;  %v528_v51 = vadd.f32 %v527_v49, %v460_v47  ;;  %v529_v52 = vpop.f32.mrb[9].mxu1 }
 0x1e9   : > { %v1732_v55 = vadd.f32 %v547_v48, %v1611_v6  ;;  %v530_v56 = vadd.f32 %v529_v52, %v460_v47  ;;  %v531_v57 = vpop.f32.mrb[10].mxu1 }
 0x1ea   : > { %v540_v59 = vmul.f32 0.2, %v528_v51  ;;  %v532_v60 = vadd.f32 %v531_v57, %v465_v53  ;;  %v533_v61 = vpop.f32.mrb[11].mxu1  ;;  %v565_v5 = vpack.c.bf16 %v1726_v50, %v1735_v58 }
 0x1eb   : > { %v541_v62 = vmul.f32 0.2, %v530_v56  ;;  %v534_v9 = vadd.f32 %v533_v61, %v465_v53  ;;  %v566_v63 = vpack.c.bf16 %v1732_v55, %v1729_v54  ;;  %v1401_v61 = vld [vmem:[%s1907_s3 + $0x10] sm:$0xff]  }
 0x1ec   : > { %v542_v1 = vmul.f32 0.2, %v532_v60  ;;  %v548_v3 = vmax.f32 %v528_v51, %v540_v59 }
 0x1ed   : > { %v549_v2 = vmax.f32 %v530_v56, %v541_v62  ;;  %v543_v6 = vmul.f32 0.2, %v534_v9  ;;  %610 = vmatprep.subr.bf16.mxu0 %v566_v63  ;;  %v1402_v62 = vld [vmem:[%s1907_s3 + $0x18] sm:$0xff]  }
 0x1ee   : > { %v550_v4 = vmax.f32 %v532_v60, %v542_v1  ;;  %611 = vmatpush1.bf16.msra.mxu0 %v565_v5  ;;  %v1751_v16 = vadd.f32 %v548_v3, %v1627_v14 }
 0x1ef   : > { %v551_v7 = vmax.f32 %v534_v9, %v543_v6  ;;  %v1745_v12 = vadd.f32 %v549_v2, %v1619_v10  ;;  %v1400_v10 = vld [vmem:[%s1905_s1 + $0x18] sm:$0xff]   ;;  %v701_v2 = vpop.permute.xlu1 %700 }
 0x1f0   : > { %v1742_v8 = vadd.f32 %v550_v4, %v1629_v15  ;;  %v1399_v15 = vld [vmem:[%s1905_s1 + $0x10] sm:$0xff]  }
 0x1f1   : > { %v1748_v13 = vadd.f32 %v551_v7, %v1621_v11  ;;  %v577_v11 = vpop.permute.xlu0 %576 }
 0x1f2   : > { %v567_v18 = vpack.c.bf16 %v1742_v8, %v1751_v16 }
 0x1f3   : > { %v568_v17 = vpack.c.bf16 %v1748_v13, %v1745_v12 }
 0x1f5   : > { %612 = vmatprep.subr.bf16.mxu0 %v568_v17  ;;  %v587_v33 = vpop.permute.xlu0 %586 }
 0x1f6   : > { %613 = vmatpush1.bf16.msra.mxu0 %v567_v18 }
 0x1f9   : > { %1282 = vmatmul.mubr.msk.bf16.vlgmr.msra.gmra.mrb[4].mxu0 %vm359_vm0, %v1399_v15  ;;  %v696_v9 = vpop.permute.xlu0 %695 }
 0x1fa   : > { %652 = vmatprep.mubr.bf16.mxu0 %v1489_v0 }
 0x201   : > { %1283 = vmatmul.mubr.msk.bf16.gmra.mrb[8].mxu0 %vm359_vm0, %v1400_v10 }
 0x202   : > { %888 = vmatprep.mubr.bf16.mxu0 %v1489_v0 }
 0x2cc   : > { %v644_v14 = vpop.f32.mrb[4].mxu0 }
 0x2cd   : > { %v645_v19 = vadd.f32 %v644_v14, %v577_v11  ;;  %v646_v20 = vpop.f32.mrb[5].mxu0 }
 0x2ce   : > { %v647_v22 = vadd.f32 %v646_v20, %v577_v11  ;;  %v648_v23 = vpop.f32.mrb[6].mxu0 }
 0x2cf   : > { %v663_v24 = vmul.f32 0.2, %v645_v19  ;;  %v649_v25 = vadd.f32 %v648_v23, %v582_v21  ;;  %v650_v26 = vpop.f32.mrb[7].mxu0 }
 0x2d0   : > { %v664_v27 = vmul.f32 0.2, %v647_v22  ;;  %v651_v28 = vadd.f32 %v650_v26, %v582_v21  ;;  %v706_v21 = vpop.permute.xlu0 %705 }
 0x2d1   : > { %v665_v29 = vmul.f32 0.2, %v649_v25  ;;  %v671_v31 = vmax.f32 %v645_v19, %v663_v24 }
 0x2d2   : > { %v666_v30 = vmul.f32 0.2, %v651_v28  ;;  %v672_v34 = vmax.f32 %v647_v22, %v664_v27  ;;  %v711_v27 = vpop.permute.xlu1 %710 }
 0x2d3   : > { %v673_v32 = vmax.f32 %v649_v25, %v665_v29 }
 0x2d4   : > { %v674_v35 = vmax.f32 %v651_v28, %v666_v30  ;;  %v654_v36 = vpop.f32.mrb[8].mxu0 }
 0x2d5   : > { %v684_v37 = vpack.c.bf16 %v673_v32, %v671_v31  ;;  %v655_v38 = vadd.f32 %v654_v36, %v587_v33  ;;  %v656_v39 = vpop.f32.mrb[9].mxu0 }
 0x2d6   : > { %v657_v41 = vadd.f32 %v656_v39, %v587_v33  ;;  %v658_v42 = vpop.f32.mrb[10].mxu0  ;;  %v685_v43 = vpack.c.bf16 %v674_v35, %v672_v34 }
 0x2d7   : > { %v667_v44 = vmul.f32 0.2, %v655_v38  ;;  %v659_v45 = vadd.f32 %v658_v42, %v592_v40  ;;  %v660_v46 = vpop.f32.mrb[11].mxu0 }
 0x2d8   : > { %v668_v47 = vmul.f32 0.2, %v657_v41  ;;  %v661_v48 = vadd.f32 %v660_v46, %v592_v40  ;;  %729 = vmatprep.subr.bf16.mxu1 %v685_v43 }
 0x2d9   : > { %v669_v49 = vmul.f32 0.2, %v659_v45  ;;  %730 = vmatpush1.bf16.msra.mxu1 %v684_v37  ;;  %v675_v52 = vmax.f32 %v655_v38, %v667_v44 }
 0x2da   : > { %v670_v51 = vmul.f32 0.2, %v661_v48  ;;  %v676_v56 = vmax.f32 %v657_v41, %v668_v47 }
 0x2db   : > { %v677_v53 = vmax.f32 %v659_v45, %v669_v49 }
 0x2dc   : > { %v678_v57 = vmax.f32 %v661_v48, %v670_v51  ;;  %v828_v51 = vpop.permute.xlu1 %827 }
 0x2dd   : > { %v686_v59 = vpack.c.bf16 %v677_v53, %v675_v52 }
 0x2de   : > { %v687_v60 = vpack.c.bf16 %v678_v57, %v676_v56 }
 0x2e0   : > { %731 = vmatprep.subr.bf16.mxu1 %v687_v60 }
 0x2e1   : > { %732 = vmatpush1.bf16.msra.mxu1 %v686_v59 }
 0x2e4   : > { %1294 = vmatmul.mubr.msk.bf16.vlgmr.msra.gmra.mrb[12].mxu1 %vm359_vm0, %v1401_v61 }
 0x2e5   : > { %771 = vmatprep.mubr.bf16.mxu1 %v1489_v0 }
 0x2ec   : > { %1295 = vmatmul.mubr.msk.bf16.gmra.mrb[16].mxu1 %vm359_vm0, %v1402_v62 }
 0x2ed   : > { %1007 = vmatprep.mubr.bf16.mxu1 %v1489_v0 }
 0x3b7   : > { %v763_v63 = vpop.f32.mrb[12].mxu1 }
 0x3b8   : > { %v764_v5 = vadd.f32 %v763_v63, %v696_v9  ;;  %v765_v1 = vpop.f32.mrb[13].mxu1 }
 0x3b9   : > { %v766_v6 = vadd.f32 %v765_v1, %v696_v9  ;;  %v767_v3 = vpop.f32.mrb[14].mxu1 }
 0x3ba   : > { %v782_v4 = vmul.f32 0.2, %v764_v5  ;;  %v768_v7 = vadd.f32 %v767_v3, %v701_v2  ;;  %v769_v17 = vpop.f32.mrb[15].mxu1 }
 0x3bb   : > { %v783_v18 = vmul.f32 0.2, %v766_v6  ;;  %v770_v15 = vadd.f32 %v769_v17, %v701_v2 }
 0x3bc   : > { %v784_v10 = vmul.f32 0.2, %v768_v7  ;;  %v790_v19 = vmax.f32 %v764_v5, %v782_v4 }
 0x3bd   : > { %v791_v11 = vmax.f32 %v766_v6, %v783_v18  ;;  %v785_v14 = vmul.f32 0.2, %v770_v15  ;;  %v838_v18 = vpop.permute.xlu1 %837 }
 0x3be   : > { %v792_v20 = vmax.f32 %v768_v7, %v784_v10  ;;  %v1787_v32 = vadd.f32 %v790_v19, %v1735_v58 }
 0x3bf   : > { %v793_v22 = vmax.f32 %v770_v15, %v785_v14  ;;  %v773_v23 = vpop.f32.mrb[16].mxu1  ;;  %v1781_v28 = vadd.f32 %v791_v11, %v1729_v54 }
 0x3c0   : > { %v1778_v24 = vadd.f32 %v792_v20, %v1726_v50  ;;  %v774_v25 = vadd.f32 %v773_v23, %v706_v21  ;;  %v775_v26 = vpop.f32.mrb[17].mxu1 }
 0x3c1   : > { %v1784_v29 = vadd.f32 %v793_v22, %v1732_v55  ;;  %v776_v30 = vadd.f32 %v775_v26, %v706_v21  ;;  %v777_v31 = vpop.f32.mrb[18].mxu1 }
 0x3c2   : > { %v786_v33 = vmul.f32 0.2, %v774_v25  ;;  %v778_v34 = vadd.f32 %v777_v31, %v711_v27  ;;  %v779_v35 = vpop.f32.mrb[19].mxu1  ;;  %v811_v54 = vpack.c.bf16 %v1778_v24, %v1787_v32 }
 0x3c3   : > { %v787_v36 = vmul.f32 0.2, %v776_v30  ;;  %v780_v50 = vadd.f32 %v779_v35, %v711_v27  ;;  %v812_v37 = vpack.c.bf16 %v1784_v29, %v1781_v28  ;;  %v1405_v35 = vld [vmem:[%s1907_s3 + $0x20] sm:$0xff]  }
 0x3c4   : > { %v788_v38 = vmul.f32 0.2, %v778_v34  ;;  %v794_v40 = vmax.f32 %v774_v25, %v786_v33 }
 0x3c5   : > { %v795_v39 = vmax.f32 %v776_v30, %v787_v36  ;;  %v789_v55 = vmul.f32 0.2, %v780_v50  ;;  %856 = vmatprep.subr.bf16.mxu0 %v812_v37  ;;  %v1406_v36 = vld [vmem:[%s1907_s3 + $0x28] sm:$0xff]  }
 0x3c6   : > { %v796_v41 = vmax.f32 %v778_v34, %v788_v38  ;;  %857 = vmatpush1.bf16.msra.mxu0 %v811_v54  ;;  %v1803_v45 = vadd.f32 %v794_v40, %v1751_v16 }
 0x3c7   : > { %v797_v58 = vmax.f32 %v780_v50, %v789_v55  ;;  %v1797_v43 = vadd.f32 %v795_v39, %v1745_v12  ;;  %v1404_v12 = vld [vmem:[%s1905_s1 + $0x28] sm:$0xff]   ;;  %v947_v39 = vpop.permute.xlu1 %946 }
 0x3c8   : > { %v1794_v42 = vadd.f32 %v796_v41, %v1742_v8  ;;  %v1403_v8 = vld [vmem:[%s1905_s1 + $0x20] sm:$0xff]  }
 0x3c9   : > { %v1800_v44 = vadd.f32 %v797_v58, %v1748_v13  ;;  %v823_v13 = vpop.permute.xlu0 %822 }
 0x3ca   : > { %v813_v47 = vpack.c.bf16 %v1794_v42, %v1803_v45 }
 0x3cb   : > { %v814_v46 = vpack.c.bf16 %v1800_v44, %v1797_v43 }
 0x3cd   : > { %858 = vmatprep.subr.bf16.mxu0 %v814_v46  ;;  %v833_v1 = vpop.permute.xlu0 %832 }
 0x3ce   : > { %859 = vmatpush1.bf16.msra.mxu0 %v813_v47 }
 0x3d1   : > { %1306 = vmatmul.mubr.msk.bf16.vlgmr.msra.gmra.mrb[12].mxu0 %vm359_vm0, %v1403_v8  ;;  %v942_v50 = vpop.permute.xlu0 %941 }
 0x3d2   : > { %898 = vmatprep.mubr.bf16.mxu0 %v1489_v0 }
 0x3d9   : > { %1307 = vmatmul.mubr.msk.bf16.gmra.mrb[16].mxu0 %vm359_vm0, %v1404_v12 }
 0x3da   : > { %1132 = vmatprep.mubr.bf16.mxu0 %v1489_v0 }
 0x4a4   : > { %v890_v16 = vpop.f32.mrb[12].mxu0 }
 0x4a5   : > { %v891_v48 = vadd.f32 %v890_v16, %v823_v13  ;;  %v892_v49 = vpop.f32.mrb[13].mxu0 }
 0x4a6   : > { %v893_v52 = vadd.f32 %v892_v49, %v823_v13  ;;  %v894_v53 = vpop.f32.mrb[14].mxu0 }
 0x4a7   : > { %v909_v56 = vmul.f32 0.2, %v891_v48  ;;  %v895_v57 = vadd.f32 %v894_v53, %v828_v51  ;;  %v896_v59 = vpop.f32.mrb[15].mxu0 }
 0x4a8   : > { %v910_v60 = vmul.f32 0.2, %v893_v52  ;;  %v897_v61 = vadd.f32 %v896_v59, %v828_v51  ;;  %v952_v51 = vpop.permute.xlu0 %951 }
 0x4a9   : > { %v911_v62 = vmul.f32 0.2, %v895_v57  ;;  %v917_v63 = vmax.f32 %v891_v48, %v909_v56 }
 0x4aa   : > { %v912_v9 = vmul.f32 0.2, %v897_v61  ;;  %v918_v2 = vmax.f32 %v893_v52, %v910_v60 }
 0x4ab   : > { %v919_v5 = vmax.f32 %v895_v57, %v911_v62 }
 0x4ac   : > { %v920_v6 = vmax.f32 %v897_v61, %v912_v9  ;;  %v900_v3 = vpop.f32.mrb[16].mxu0  ;;  %v957_v61 = vpop.permute.xlu1 %956 }
 0x4ad   : > { %v930_v4 = vpack.c.bf16 %v919_v5, %v917_v63  ;;  %v901_v7 = vadd.f32 %v900_v3, %v833_v1  ;;  %v902_v17 = vpop.f32.mrb[17].mxu0 }
 0x4ae   : > { %v903_v15 = vadd.f32 %v902_v17, %v833_v1  ;;  %v904_v10 = vpop.f32.mrb[18].mxu0  ;;  %v931_v11 = vpack.c.bf16 %v920_v6, %v918_v2 }
 0x4af   : > { %v913_v14 = vmul.f32 0.2, %v901_v7  ;;  %v905_v19 = vadd.f32 %v904_v10, %v838_v18  ;;  %v906_v20 = vpop.f32.mrb[19].mxu0 }
 0x4b0   : > { %v914_v21 = vmul.f32 0.2, %v903_v15  ;;  %v907_v22 = vadd.f32 %v906_v20, %v838_v18  ;;  %975 = vmatprep.subr.bf16.mxu1 %v931_v11 }
 0x4b1   : > { %v915_v23 = vmul.f32 0.2, %v905_v19  ;;  %976 = vmatpush1.bf16.msra.mxu1 %v930_v4  ;;  %v921_v26 = vmax.f32 %v901_v7, %v913_v14 }
 0x4b2   : > { %v916_v25 = vmul.f32 0.2, %v907_v22  ;;  %v922_v30 = vmax.f32 %v903_v15, %v914_v21 }
 0x4b3   : > { %v923_v27 = vmax.f32 %v905_v19, %v915_v23 }
 0x4b4   : > { %v924_v31 = vmax.f32 %v907_v22, %v916_v25  ;;  %v1407_v22 = vld [vmem:[%s1909_s5] sm:$0xff]   ;;  %v1072_v25 = vpop.permute.xlu1 %1071 }
 0x4b5   : > { %v932_v33 = vpack.c.bf16 %v923_v27, %v921_v26 }
 0x4b6   : > { %v933_v34 = vpack.c.bf16 %v924_v31, %v922_v30 }
 0x4b8   : > { %977 = vmatprep.subr.bf16.mxu1 %v933_v34 }
 0x4b9   : > { %978 = vmatpush1.bf16.msra.mxu1 %v932_v33 }
 0x4bc   : > { %1318 = vmatmul.mubr.msk.bf16.vlgmr.msra.gmra.mrb[20].mxu1 %vm359_vm0, %v1405_v35 }
 0x4bd   : > { %1017 = vmatprep.mubr.bf16.mxu1 %v1489_v0 }
 0x4c4   : > { %1319 = vmatmul.mubr.msk.bf16.gmra.mrb[24].mxu1 %vm359_vm0, %v1406_v36 }
 0x58f   : > { %v1009_v37 = vpop.f32.mrb[20].mxu1 }
 0x590   : > { %v1010_v54 = vadd.f32 %v1009_v37, %v942_v50  ;;  %v1011_v38 = vpop.f32.mrb[21].mxu1 }
 0x591   : > { %v1012_v55 = vadd.f32 %v1011_v38, %v942_v50  ;;  %v1013_v40 = vpop.f32.mrb[22].mxu1  ;;  %v1082_v50 = vpop.permute.xlu1 %1081 }
 0x592   : > { %v1028_v41 = vmul.f32 0.2, %v1010_v54  ;;  %v1014_v58 = vadd.f32 %v1013_v40, %v947_v39  ;;  %v1015_v46 = vpop.f32.mrb[23].mxu1 }
 0x593   : > { %v1029_v47 = vmul.f32 0.2, %v1012_v55  ;;  %v1016_v8 = vadd.f32 %v1015_v46, %v947_v39 }
 0x594   : > { %v1036_v12 = vmax.f32 %v1010_v54, %v1028_v41  ;;  %v1030_v13 = vmul.f32 0.2, %v1014_v58 }
 0x595   : > { %v1037_v16 = vmax.f32 %v1012_v55, %v1029_v47  ;;  %v1031_v48 = vmul.f32 0.2, %v1016_v8 }
 0x596   : > { %v1038_v49 = vmax.f32 %v1014_v58, %v1030_v13  ;;  %v1044_v56 = vadd.f32 %v1036_v12, %v1787_v32 }
 0x597   : > { %v1039_v52 = vmax.f32 %v1016_v8, %v1031_v48  ;;  %v1019_v53 = vpop.f32.mrb[24].mxu1  ;;  %v1045_v62 = vadd.f32 %v1037_v16, %v1781_v28 }
 0x598   : > { %v1046_v57 = vadd.f32 %v1038_v49, %v1778_v24  ;;  %v1020_v59 = vadd.f32 %v1019_v53, %v952_v51  ;;  %v1021_v60 = vpop.f32.mrb[25].mxu1 }
 0x599   : > { %v1047_v9 = vadd.f32 %v1039_v52, %v1784_v29  ;;  %v1022_v63 = vadd.f32 %v1021_v60, %v952_v51  ;;  %v1023_v5 = vpop.f32.mrb[26].mxu1 }
 0x59a   : > { %v1056_v1 = vpack.c.bf16 %v1046_v57, %v1044_v56  ;;  %v1032_v2 = vmul.f32 0.2, %v1020_v59  ;;  %v1024_v6 = vadd.f32 %v1023_v5, %v957_v61  ;;  %v1025_v3 = vpop.f32.mrb[27].mxu1 }
 0x59b   : > { %v1033_v4 = vmul.f32 0.2, %v1022_v63  ;;  %v1026_v7 = vadd.f32 %v1025_v3, %v957_v61  ;;  %v1057_v17 = vpack.c.bf16 %v1047_v9, %v1045_v62 }
 0x59c   : > { %v1040_v18 = vmax.f32 %v1020_v59, %v1032_v2  ;;  %v1034_v32 = vmul.f32 0.2, %v1024_v6 }
 0x59d   : > { %v1041_v15 = vmax.f32 %v1022_v63, %v1033_v4  ;;  %v1035_v24 = vmul.f32 0.2, %v1026_v7  ;;  %1100 = vmatprep.subr.bf16.mxu0 %v1057_v17 }
 0x59e   : > { %v1042_v10 = vmax.f32 %v1024_v6, %v1034_v32  ;;  %1101 = vmatpush1.bf16.msra.mxu0 %v1056_v1  ;;  %v1048_v29 = vadd.f32 %v1040_v18, %v1803_v45 }
 0x59f   : > { %v1043_v28 = vmax.f32 %v1026_v7, %v1035_v24  ;;  %v1049_v14 = vadd.f32 %v1041_v15, %v1797_v43  ;;  %v1067_v43 = vpop.permute.xlu0 %1066 }
 0x5a0   : > { %v1050_v11 = vadd.f32 %v1042_v10, %v1794_v42  ;;  %v1408_v42 = vld [vmem:[%s1909_s5 + $0x8] sm:$0xff]  }
 0x5a1   : > { %v1051_v19 = vadd.f32 %v1043_v28, %v1800_v44 }
 0x5a2   : > { %v1058_v20 = vpack.c.bf16 %v1050_v11, %v1048_v29 }
 0x5a3   : > { %v1059_v21 = vpack.c.bf16 %v1051_v19, %v1049_v14  ;;  %v1077_v33 = vpop.permute.xlu0 %1076 }
 0x5a5   : > { %1102 = vmatprep.subr.bf16.mxu0 %v1059_v21 }
 0x5a6   : > { %1103 = vmatpush1.bf16.msra.mxu0 %v1058_v20 }
 0x5a9   : > { %1322 = vmatmul.mubr.msk.bf16.vlgmr.msra.gmra.mrb[20].mxu0 %vm359_vm0, %v1407_v22 }
 0x5aa   : > { %1142 = vmatprep.mubr.bf16.mxu0 %v1489_v0 }
 0x5b1   : > { %1323 = vmatmul.mubr.msk.bf16.gmra.mrb[24].mxu0 %vm359_vm0, %v1408_v42 }
 0x67c   : > { %v1134_v44 = vpop.f32.mrb[20].mxu0 }
 0x67d   : > { %v1135_v45 = vadd.f32 %v1134_v44, %v1067_v43  ;;  %v1136_v23 = vpop.f32.mrb[21].mxu0 }
 0x67e   : > { %v1137_v26 = vadd.f32 %v1136_v23, %v1067_v43  ;;  %v1138_v27 = vpop.f32.mrb[22].mxu0 }
 0x67f   : > { %1153 = vst [vmem:[%s296_s15] sm:$0xff] %v1135_v45  ;;  %v1139_v0 = vadd.f32 %v1138_v27, %v1072_v25  ;;  %v1140_v30 = vpop.f32.mrb[23].mxu0 }
 0x680   : > { %1154 = vst [vmem:[%s296_s15 + $0x8] sm:$0xff] %v1137_v26  ;;  %v1141_v31 = vadd.f32 %v1140_v30, %v1072_v25 }
 0x681   : > { %1155 = vst [vmem:[%s296_s15 + $0x10] sm:$0xff] %v1139_v0 }
 0x682   : > { %1156 = vst [vmem:[%s296_s15 + $0x18] sm:$0xff] %v1141_v31 }
 0x684   : > { %v1144_v34 = vpop.f32.mrb[24].mxu0 }
 0x685   : > { %v1145_v35 = vadd.f32 %v1144_v34, %v1077_v33  ;;  %v1146_v36 = vpop.f32.mrb[25].mxu0 }
 0x686   : > { %v1147_v37 = vadd.f32 %v1146_v36, %v1077_v33  ;;  %v1148_v54 = vpop.f32.mrb[26].mxu0 }
 0x687   : > { %1157 = vst [vmem:[%s296_s15 + $0x20] sm:$0xff] %v1145_v35  ;;  %v1149_v38 = vadd.f32 %v1148_v54, %v1082_v50  ;;  %v1150_v39 = vpop.f32.mrb[27].mxu0 }
 0x688   : > { %1158 = vst [vmem:[%s296_s15 + $0x28] sm:$0xff] %v1147_v37  ;;  %v1151_v55 = vadd.f32 %v1150_v39, %v1082_v50 }
 0x689   : > { %1159 = vst [vmem:[%s296_s15 + $0x30] sm:$0xff] %v1149_v38 }
 0x68a   : > { %1160 = vst [vmem:[%s296_s15 + $0x38] sm:$0xff] %v1151_v55 }
 0x68b   : > { %1422 = shalt.err (!%p1419_p5)
}
 0x68c   : > { %s1423_s8 = scalar_lea.hbm %s1852_s20, 1024  ;;  %s1427_s15 = scalar_lea.hbm %s1911_s7, 2048 }
 0x68d   : > { %p1424_p6 = scmp.ne.s32.totalorder %s1852_s20, %s1423_s8  ;;  %p1428_p10 = scmp.lt.u32.totalorder %s1852_s20, %s1911_s7 }
 0x68e   : > { %p1429_p11 = scmp.lt.u32.totalorder %s1427_s15, %s1423_s8  ;;  %p1431_p13 = scmp.lt.u32.totalorder %s1423_s8, %s1852_s20 }
 0x68f   : > { %p1425_p7 = pnand %p1424_p6, %p1573_p4 }
 0x690   : > { %p1430_p12 = por %p1429_p11, %p1428_p10 }
 0x691   : > { %p1426_p9 = pneg %p1425_p7 }
 0x692   : > { %p1432_p0 = por %p1431_p13, %p1430_p12 }
 0x694   : > { %p1433_p1 = pnand %p1432_p0, %p1426_p9 }
 0x696   : > { %1436 = shalt.err (!%p1433_p1)
}
 0x697   : > { %s1491_s19 = smov 256   ;;  %s1492_s21 = smov 16  }
 0x698   : > { %1335 = dma.vmem_to_hbm [thread:$0]  (%p1573_p4), %s1854_s17, 1024, %s1852_s20, %s1858_s27, %s1491_s19, %s1491_s19, %s1492_s21  }
 0x699 PF: > { %p1341_p2 = scmp.ge.s32.totalorder %s1487_s29, 2  ;;  %s1192_s22 = sand.u32 1, %s1467_s24  }
 0x69a   : > { %s1193_s23 = scalar_lea.sflag [#allocation3], %s1192_s22 }
 0x69b   : > { %p1338_p3 = pnand %p1341_p2, %p1580_p8 }
 0x69d   : > { %1462 = dma.done.wait (!%p1338_p3), %s1193_s23, 1024  }
 0x69e   : > { %1464 = vsyncadd (!%p1338_p3), %s1193_s23, 4294966272  ;;  %s20_s29 = sadd.s32 1, %s1487_s29   ;;  %s1914_s24 = smov %s1471_s25 }
 0x69f   : > { %p17_p5 = scmp.ge.s32.totalorder %s20_s29, 4   ;;  %s1915_s25 = smov %s1475_s26 }
 0x6a0   : > { %s1916_s26 = smov %s1586_s14  ;;  %s1917_s27 = smov %s1483_s28 }
 0x6a1   : > { %s1918_s28 = smov %s1920_s9  ;;  %19 = sbr.rel (!%p17_p5) target bundleno = 4 (0x4), region = 91 }
 0x6a8   :  { %1198 = vsyncpa [#allocation3], 1 }
 0x6a9   :  { %1200 = vsyncpa [#allocation3 + $0x1], 1 }

</bundles_post_ra>
